<compile_context>
chip_gen: v6e
topology: v6e:2x2x1
jax: 0.10.0
libtpu: 0.0.40
codegen_flags: <defaults>
</compile_context>

<pallas_src>
import jax
import jax.numpy as jnp
from jax.experimental import pallas as pl
from jax.experimental.pallas import tpu as pltpu


def _discriminator_kernel(bias_ref, g_ref, w_ref, h_ref, nh_ref, nx_ref, out_ref):
    B, D = g_ref.shape
    # Bilinear right-hand projection on the MXU: u[b, i] = sum_j W[i, j] * g[b, j].
    u = jax.lax.dot_general(
        g_ref[...], w_ref[...],
        dimension_numbers=(((1,), (1,)), ((), ())),
        preferred_element_type=jnp.float32)                # (B, D)
    ut = u.T                                               # (D, B): column b lane-broadcasts below
    bias = bias_ref[0]

    rows = []
    for x_ref in (h_ref, nh_ref, nx_ref):                  # score blocks: rl, H_fk, X_fk
        for b in range(B):
            # (N, D) slab -> (D, N): put N = 128 on the lane axis (XLU transpose, slot idle).
            xt = x_ref[b].T                                 # (D, N)
            # out[s*B + b, n] = sum_d X_s[b, n, d] * u[b, d]: lane-broadcast mul + sublane reduce.
            rows.append(jnp.sum(xt * ut[:, b:b + 1], axis=0, keepdims=True))   # (1, N)

    # Single lane-dense store of the whole (3B, N) output tile.
    out_ref[...] = jnp.concatenate(rows, axis=0) + bias


def discriminator_forward(g, H, neg_H, neg_X, weight, bias):
    """Pallas implementation of Discriminator.forward.

    g: (B, D); H/neg_H/neg_X: (B, N, D); weight: (1, D, D); bias: (1,).
    Returns logits.reshape(128, -1), i.e. (N, 3*B) — requires N == 128 (module hard-codes it).
    """
    B, N, D = H.shape
    if N != 128:
        raise ValueError("Discriminator hard-codes logits.reshape(128, -1); "
                         f"num_nodes must be 128, got {N}")

    out = pl.pallas_call(
        _discriminator_kernel,
        out_shape=jax.ShapeDtypeStruct((3 * B, N), jnp.float32),
        in_specs=[
            pl.BlockSpec(memory_space=pltpu.MemorySpace.SMEM),   # bias (1,)
            pl.BlockSpec(memory_space=pltpu.MemorySpace.VMEM),   # g (B, D)
            pl.BlockSpec(memory_space=pltpu.MemorySpace.VMEM),   # W[0] (D, D)
            pl.BlockSpec(memory_space=pltpu.MemorySpace.VMEM),   # H (B, N, D)
            pl.BlockSpec(memory_space=pltpu.MemorySpace.VMEM),   # neg_H (B, N, D)
            pl.BlockSpec(memory_space=pltpu.MemorySpace.VMEM),   # neg_X (B, N, D)
        ],
        out_specs=pl.BlockSpec(memory_space=pltpu.MemorySpace.VMEM),
    )(bias, g, weight[0], H, neg_H, neg_X)

    # Row c = s*B + b of `out` is exactly column c of torch.cat(dim=1); with N == 128 the
    # module's reshape(128, -1) is the identity on the transposed slab.
    return out.T.reshape(128, -1)


if __name__ == "__main__":
    B, N, D = 2, 128, 32   # batch, num_nodes (=128 so reshape(128, -1) is exact), n_h

    key = jax.random.PRNGKey(0)
    kg, kh, knh, knx, kw = jax.random.split(key, 5)
    g = jax.random.normal(kg, (B, D), dtype=jnp.float32)
    H = jax.random.normal(kh, (B, N, D), dtype=jnp.float32)
    neg_H = jax.random.normal(knh, (B, N, D), dtype=jnp.float32)
    neg_X = jax.random.normal(knx, (B, N, D), dtype=jnp.float32)

    # nn.Bilinear(D, D, 1) params: weight (1, D, D) xavier-uniform, bias filled with 0.
    fan_in, fan_out = D * D, 1 * D               # torch fan calc for a 3-D weight tensor
    bound = (6.0 / (fan_in + fan_out)) ** 0.5
    weight = jax.random.uniform(kw, (1, D, D), jnp.float32, -bound, bound)
    bias = jnp.zeros((1,), jnp.float32)

    logits = discriminator_forward(g, H, neg_H, neg_X, weight, bias)
    jax.block_until_ready(logits)

    # Pure-jnp reference for a sanity check.
    hp = jax.lax.Precision.HIGHEST
    u_ref = jnp.einsum("bj,ij->bi", g, weight[0], precision=hp)              # (B, D)
    blocks = [jnp.einsum("bnd,bd->bn", x, u_ref, precision=hp) + bias[0]
              for x in (H, neg_H, neg_X)]                                    # each (B, N)
    ref = jnp.concatenate([blk.T for blk in blocks], axis=1).reshape(128, -1)

    assert logits.shape == (128, 3 * B), logits.shape
    assert bool(jnp.all(jnp.isfinite(logits)))
    assert bool(jnp.allclose(logits, ref, rtol=1e-3, atol=1e-3))
    print("KERNEL_OK")
</pallas_src>

<mosaic_0001>
module attributes {stable_mosaic.version = 11 : i64} {
  func.func @_discriminator_kernel(%arg0: memref<1xf32, #tpu.memory_space<smem>>, %arg1: memref<2x32xf32, #tpu.memory_space<vmem>>, %arg2: memref<32x32xf32, #tpu.memory_space<vmem>>, %arg3: memref<2x128x32xf32, #tpu.memory_space<vmem>>, %arg4: memref<2x128x32xf32, #tpu.memory_space<vmem>>, %arg5: memref<2x128x32xf32, #tpu.memory_space<vmem>>, %arg6: memref<6x128xf32, #tpu.memory_space<vmem>>) attributes {dimension_semantics = [], scalar_prefetch = 0 : i64, scratch_operands = 0 : i64, tpu.core_type = #tpu.core_type<tc>} {
    %c0 = arith.constant 0 : index
    %c0_0 = arith.constant 0 : index
    %0 = vector.load %arg1[%c0, %c0_0] : memref<2x32xf32, #tpu.memory_space<vmem>>, vector<2x32xf32>
    %c0_1 = arith.constant 0 : index
    %c0_2 = arith.constant 0 : index
    %1 = vector.load %arg2[%c0_1, %c0_2] : memref<32x32xf32, #tpu.memory_space<vmem>>, vector<32x32xf32>
    %cst = arith.constant dense<0.000000e+00> : vector<2x32xf32>
    %2 = tpu.matmul %0, %1, %cst {dimension_numbers = #tpu.dot_dimension_numbers<[1], [1], [0], [0], [0, 0, 1, 0], [], []>} : vector<2x32xf32>, vector<32x32xf32>, vector<2x32xf32> -> vector<2x32xf32>
    %3 = tpu.transpose %2, [1, 0] : vector<2x32xf32> -> vector<32x2xf32>
    %c0_3 = arith.constant 0 : index
    %4 = memref.load %arg0[%c0_3] : memref<1xf32, #tpu.memory_space<smem>>
    %c0_4 = arith.constant 0 : index
    %c0_5 = arith.constant 0 : index
    %c0_6 = arith.constant 0 : index
    %5 = vector.load %arg3[%c0_4, %c0_5, %c0_6] : memref<2x128x32xf32, #tpu.memory_space<vmem>>, vector<1x128x32xf32>
    %6 = vector.shape_cast %5 : vector<1x128x32xf32> to vector<128x32xf32>
    %7 = tpu.transpose %6, [1, 0] : vector<128x32xf32> -> vector<32x128xf32>
    %8 = vector.extract_strided_slice %3 {offsets = [0, 0], sizes = [32, 1], strides = [1, 1]} : vector<32x2xf32> to vector<32x1xf32>
    %9 = vector.broadcast %8 : vector<32x1xf32> to vector<32x128xf32>
    %10 = arith.mulf %7, %9 : vector<32x128xf32>
    %cst_7 = arith.constant dense<0.000000e+00> : vector<128xf32>
    %11 = vector.multi_reduction <add>, %10, %cst_7 [0] : vector<32x128xf32> to vector<128xf32>
    %12 = vector.shape_cast %11 : vector<128xf32> to vector<1x128xf32>
    %c1 = arith.constant 1 : index
    %c0_8 = arith.constant 0 : index
    %c0_9 = arith.constant 0 : index
    %13 = vector.load %arg3[%c1, %c0_8, %c0_9] : memref<2x128x32xf32, #tpu.memory_space<vmem>>, vector<1x128x32xf32>
    %14 = vector.shape_cast %13 : vector<1x128x32xf32> to vector<128x32xf32>
    %15 = tpu.transpose %14, [1, 0] : vector<128x32xf32> -> vector<32x128xf32>
    %16 = vector.extract_strided_slice %3 {offsets = [0, 1], sizes = [32, 1], strides = [1, 1]} : vector<32x2xf32> to vector<32x1xf32>
    %17 = vector.broadcast %16 : vector<32x1xf32> to vector<32x128xf32>
    %18 = arith.mulf %15, %17 : vector<32x128xf32>
    %cst_10 = arith.constant dense<0.000000e+00> : vector<128xf32>
    %19 = vector.multi_reduction <add>, %18, %cst_10 [0] : vector<32x128xf32> to vector<128xf32>
    %20 = vector.shape_cast %19 : vector<128xf32> to vector<1x128xf32>
    %c0_11 = arith.constant 0 : index
    %c0_12 = arith.constant 0 : index
    %c0_13 = arith.constant 0 : index
    %21 = vector.load %arg4[%c0_11, %c0_12, %c0_13] : memref<2x128x32xf32, #tpu.memory_space<vmem>>, vector<1x128x32xf32>
    %22 = vector.shape_cast %21 : vector<1x128x32xf32> to vector<128x32xf32>
    %23 = tpu.transpose %22, [1, 0] : vector<128x32xf32> -> vector<32x128xf32>
    %24 = vector.extract_strided_slice %3 {offsets = [0, 0], sizes = [32, 1], strides = [1, 1]} : vector<32x2xf32> to vector<32x1xf32>
    %25 = vector.broadcast %24 : vector<32x1xf32> to vector<32x128xf32>
    %26 = arith.mulf %23, %25 : vector<32x128xf32>
    %cst_14 = arith.constant dense<0.000000e+00> : vector<128xf32>
    %27 = vector.multi_reduction <add>, %26, %cst_14 [0] : vector<32x128xf32> to vector<128xf32>
    %28 = vector.shape_cast %27 : vector<128xf32> to vector<1x128xf32>
    %c1_15 = arith.constant 1 : index
    %c0_16 = arith.constant 0 : index
    %c0_17 = arith.constant 0 : index
    %29 = vector.load %arg4[%c1_15, %c0_16, %c0_17] : memref<2x128x32xf32, #tpu.memory_space<vmem>>, vector<1x128x32xf32>
    %30 = vector.shape_cast %29 : vector<1x128x32xf32> to vector<128x32xf32>
    %31 = tpu.transpose %30, [1, 0] : vector<128x32xf32> -> vector<32x128xf32>
    %32 = vector.extract_strided_slice %3 {offsets = [0, 1], sizes = [32, 1], strides = [1, 1]} : vector<32x2xf32> to vector<32x1xf32>
    %33 = vector.broadcast %32 : vector<32x1xf32> to vector<32x128xf32>
    %34 = arith.mulf %31, %33 : vector<32x128xf32>
    %cst_18 = arith.constant dense<0.000000e+00> : vector<128xf32>
    %35 = vector.multi_reduction <add>, %34, %cst_18 [0] : vector<32x128xf32> to vector<128xf32>
    %36 = vector.shape_cast %35 : vector<128xf32> to vector<1x128xf32>
    %c0_19 = arith.constant 0 : index
    %c0_20 = arith.constant 0 : index
    %c0_21 = arith.constant 0 : index
    %37 = vector.load %arg5[%c0_19, %c0_20, %c0_21] : memref<2x128x32xf32, #tpu.memory_space<vmem>>, vector<1x128x32xf32>
    %38 = vector.shape_cast %37 : vector<1x128x32xf32> to vector<128x32xf32>
    %39 = tpu.transpose %38, [1, 0] : vector<128x32xf32> -> vector<32x128xf32>
    %40 = vector.extract_strided_slice %3 {offsets = [0, 0], sizes = [32, 1], strides = [1, 1]} : vector<32x2xf32> to vector<32x1xf32>
    %41 = vector.broadcast %40 : vector<32x1xf32> to vector<32x128xf32>
    %42 = arith.mulf %39, %41 : vector<32x128xf32>
    %cst_22 = arith.constant dense<0.000000e+00> : vector<128xf32>
    %43 = vector.multi_reduction <add>, %42, %cst_22 [0] : vector<32x128xf32> to vector<128xf32>
    %44 = vector.shape_cast %43 : vector<128xf32> to vector<1x128xf32>
    %c1_23 = arith.constant 1 : index
    %c0_24 = arith.constant 0 : index
    %c0_25 = arith.constant 0 : index
    %45 = vector.load %arg5[%c1_23, %c0_24, %c0_25] : memref<2x128x32xf32, #tpu.memory_space<vmem>>, vector<1x128x32xf32>
    %46 = vector.shape_cast %45 : vector<1x128x32xf32> to vector<128x32xf32>
    %47 = tpu.transpose %46, [1, 0] : vector<128x32xf32> -> vector<32x128xf32>
    %48 = vector.extract_strided_slice %3 {offsets = [0, 1], sizes = [32, 1], strides = [1, 1]} : vector<32x2xf32> to vector<32x1xf32>
    %49 = vector.broadcast %48 : vector<32x1xf32> to vector<32x128xf32>
    %50 = arith.mulf %47, %49 : vector<32x128xf32>
    %cst_26 = arith.constant dense<0.000000e+00> : vector<128xf32>
    %51 = vector.multi_reduction <add>, %50, %cst_26 [0] : vector<32x128xf32> to vector<128xf32>
    %52 = vector.shape_cast %51 : vector<128xf32> to vector<1x128xf32>
    %53 = tpu.concatenate %12, %20, %28, %36, %44, %52 in 0 : vector<1x128xf32>, vector<1x128xf32>, vector<1x128xf32>, vector<1x128xf32>, vector<1x128xf32>, vector<1x128xf32> -> vector<6x128xf32>
    %54 = vector.broadcast %4 : f32 to vector<6x128xf32>
    %55 = arith.addf %53, %54 : vector<6x128xf32>
    %c0_27 = arith.constant 0 : index
    %c0_28 = arith.constant 0 : index
    %56 = vector.load %arg6[%c0_27, %c0_28] : memref<6x128xf32, #tpu.memory_space<vmem>>, vector<6x128xf32>
    tpu.vector_store %arg6[%c0_27, %c0_28], %55 {strides = array<i32>} : memref<6x128xf32, #tpu.memory_space<vmem>>, vector<6x128xf32>,
    return
  }
}

</mosaic_0001>

<bundles_post_ra>
// kernel: tpu_custom_call.1
= control target key start
LH: loop header
LB: loop body
LE: loop exit
PB: predicated region body
PF: predicated region fallthrough
CT: control target
= control target key end

     0   :  { %vm30_vm0 = vcmask 261120   ;;  %v681_v1 = vmov 0.0   ;;  %vm682_vm1 = vmmov 0   ;;  %s1074_s0 = inlined_call_operand.<no memory space> [shape: f32[1], index: 0, kind: input, shape index: {}]   ;;  %s1075_s1 = inlined_call_operand.vmem [shape: f32[2,32], index: 1, kind: input, shape index: {}]   ;;  %s1076_s2 = inlined_call_operand.vmem [shape: f32[32,32], index: 2, kind: input, shape index: {}]   ;;  %s1077_s3 = inlined_call_operand.vmem [shape: f32[2,128,32], index: 3, kind: input, shape index: {}]   ;;  %s1078_s4 = inlined_call_operand.vmem [shape: f32[2,128,32], index: 4, kind: input, shape index: {}]   ;;  %s1079_s5 = inlined_call_operand.vmem [shape: f32[2,128,32], index: 5, kind: input, shape index: {}]   ;;  %s1080_s6 = inlined_call_operand.hbm [shape: f32[6,128], index: 6, kind: output, shape index: {}]  }
   0x1   :  { %v29_v0 = vld [vmem:[%s1076_s2 + $0x18] sm:$0xff]  ;;  %639 = vmatprep.subr.mxu0 %v681_v1  ;;  %647 = vmatprep.mubr.msk.f32.mxu0 %vm682_vm1, %v681_v1  ;;  %v149_v2 = vld [vmem:[%s1077_s3] sm:$0xff]  ;;  %v28_v3 = vld [vmem:[%s1076_s2 + $0x10] sm:$0xff] }
   0x2   :  { %640 = vmatpush3.xpose.msk.msra.mxu0 %vm30_vm0, %v29_v0  ;;  %165 = vxpose.xlu0.b32.start [1/16] (narrow) %v149_v2, 32  ;;  %v150_v4 = vld [vmem:[%s1077_s3 + $0x8] sm:$0xff]  ;;  %v151_v6 = vld [vmem:[%s1077_s3 + $0x10] sm:$0xff]  ;;  %v586_v7 = vld [vmem:[%s1077_s3 + $0x80] sm:$0xff] }
   0x3   :  { %641 = vmatprep.subr.mxu0 %v681_v1  ;;  %v27_v5 = vld [vmem:[%s1076_s2 + $0x8] sm:$0xff]  ;;  %v26_v8 = vld [vmem:[%s1076_s2] sm:$0xff]  ;;  %v152_v9 = vld [vmem:[%s1077_s3 + $0x18] sm:$0xff]  ;;  %247 = vxpose.xlu1.b32.start [1/16] (narrow) %v586_v7, 32 }
   0x4   :  { %v587_v10 = vld [vmem:[%s1077_s3 + $0x88] sm:$0xff]  ;;  %v25_v11 = vld [vmem:[%s1075_s1] sm:$0x3] }
   0x5   :  { %v153_v12 = vld [vmem:[%s1077_s3 + $0x20] sm:$0xff] }
   0x6   :  { %642 = vmatpush3.xpose.msk.msra.mxu0 %vm30_vm0, %v28_v3  ;;  %166 = vxpose.xlu0.b32.cont [2/16] (narrow) %v150_v4, 32 }
   0x7   :  { %643 = vmatprep.subr.mxu0 %v681_v1  ;;  %248 = vxpose.xlu1.b32.cont [2/16] (narrow) %v587_v10, 32 }
   0xa   :  { %644 = vmatpush3.xpose.msk.msra.mxu0 %vm30_vm0, %v27_v5  ;;  %167 = vxpose.xlu0.b32.cont [3/16] (narrow) %v151_v6, 32 }
   0xb   :  { %645 = vmatprep.subr.mxu0 %v681_v1 }
   0xe   :  { %646 = vmatpush3.xpose.msk.msra.mxu0 %vm30_vm0, %v26_v8  ;;  %168 = vxpose.xlu0.b32.cont [4/16] (narrow) %v152_v9, 32 }
   0xf   :  { %12 = vsyncpa [#allocation4], 0  ;;  %v588_v13 = vld [vmem:[%s1077_s3 + $0x90] sm:$0xff]  ;;  %v154_v14 = vld [vmem:[%s1077_s3 + $0x28] sm:$0xff]  ;;  %v683_v6 = vmov 0   ;;  %v684_v9 = vmov 1  }
  0x10   :  { %249 = vxpose.xlu1.b32.cont [3/16] (narrow) %v588_v13, 32  ;;  %v589_v15 = vld [vmem:[%s1077_s3 + $0x98] sm:$0xff]  ;;  %v155_v16 = vld [vmem:[%s1077_s3 + $0x30] sm:$0xff]  ;;  %v590_v17 = vld [vmem:[%s1077_s3 + $0xa0] sm:$0xff]  ;;  %vm554_vm2 = vcmask 1040384   ;;  %vm556_vm3 = vcmask 1041408  }
  0x11   :  { %648 = vmatmul.mubr.msk.f32.vlgmr.msra.gmra.mxu0 %vm30_vm0, %v25_v11  ;;  %v156_v18 = vld [vmem:[%s1077_s3 + $0x38] sm:$0xff]  ;;  %v591_v19 = vld [vmem:[%s1077_s3 + $0xa8] sm:$0xff]  ;;  %v157_v20 = vld [vmem:[%s1077_s3 + $0x40] sm:$0xff]  ;;  %vm558_vm4 = vcmask 1042432   ;;  %vm560_vm5 = vcmask 1043456   ;;  %vm562_vm6 = vcmask 1044480  }
  0x12   :  { %169 = vxpose.xlu0.b32.cont [5/16] (narrow) %v153_v12, 32  ;;  %v592_v21 = vld [vmem:[%s1077_s3 + $0xb0] sm:$0xff]  ;;  %v158_v22 = vld [vmem:[%s1077_s3 + $0x48] sm:$0xff]  ;;  %v593_v23 = vld [vmem:[%s1077_s3 + $0xb8] sm:$0xff]  ;;  %s685_s11 = smov [#allocation3]  }
  0x13   :  { %v159_v24 = vld [vmem:[%s1077_s3 + $0x50] sm:$0xff]  ;;  %v160_v25 = vld [vmem:[%s1077_s3 + $0x58] sm:$0xff]  ;;  %v161_v26 = vld [vmem:[%s1077_s3 + $0x60] sm:$0xff]  ;;  %s573_s12 = sshll.u32 %s685_s11, 4  ;;  %s574_s12 = int_to_ptr.vmem [resolvable:$true] %s573_s12 }
  0x14   :  { %250 = vxpose.xlu1.b32.cont [4/16] (narrow) %v589_v15, 32  ;;  %v162_v27 = vld [vmem:[%s1077_s3 + $0x68] sm:$0xff]  ;;  %v163_v28 = vld [vmem:[%s1077_s3 + $0x70] sm:$0xff]  ;;  %v164_v29 = vld [vmem:[%s1077_s3 + $0x78] sm:$0xff]  ;;  %s659_s13 = scalar_lea.vmem %s574_s12, 128  ;;  %p664_p1 = scmp.lt.s32.totalorder %s574_s12, %s574_s12 }
  0x15   :  { %v308_v30 = vld [vmem:[%s1078_s4] sm:$0xff]  ;;  %v309_v31 = vld [vmem:[%s1078_s4 + $0x8] sm:$0xff]  ;;  %v310_v32 = vld [vmem:[%s1078_s4 + $0x10] sm:$0xff]  ;;  %p660_p0 = scmp.ne.s32.totalorder %s574_s12, %s659_s13  ;;  %p665_p2 = scmp.lt.s32.totalorder %s659_s13, %s659_s13 }
  0x16   :  { %170 = vxpose.xlu0.b32.cont [6/16] (narrow) %v154_v14, 32  ;;  %v311_v33 = vld [vmem:[%s1078_s4 + $0x18] sm:$0xff]  ;;  %v312_v34 = vld [vmem:[%s1078_s4 + $0x20] sm:$0xff]  ;;  %v313_v35 = vld [vmem:[%s1078_s4 + $0x28] sm:$0xff] }
  0x17   :  { %v594_v36 = vld [vmem:[%s1077_s3 + $0xc0] sm:$0xff]  ;;  %v595_v37 = vld [vmem:[%s1077_s3 + $0xc8] sm:$0xff]  ;;  %v314_v38 = vld [vmem:[%s1078_s4 + $0x30] sm:$0xff]  ;;  %p666_p3 = por %p665_p2, %p664_p1 }
  0x18   :  { %251 = vxpose.xlu1.b32.cont [5/16] (narrow) %v590_v17, 32  ;;  %v596_v39 = vld [vmem:[%s1077_s3 + $0xd0] sm:$0xff]  ;;  %v315_v40 = vld [vmem:[%s1078_s4 + $0x38] sm:$0xff]  ;;  %v316_v42 = vld [vmem:[%s1078_s4 + $0x40] sm:$0xff] }
  0x19   :  { %v597_v41 = vld [vmem:[%s1077_s3 + $0xd8] sm:$0xff]  ;;  %v598_v43 = vld [vmem:[%s1077_s3 + $0xe0] sm:$0xff]  ;;  %v317_v44 = vld [vmem:[%s1078_s4 + $0x48] sm:$0xff]  ;;  %p667_p4 = pnand %p666_p3, %p660_p0 }
  0x1a   :  { %171 = vxpose.xlu0.b32.cont [7/16] (narrow) %v155_v16, 32  ;;  %v599_v45 = vld [vmem:[%s1077_s3 + $0xe8] sm:$0xff]  ;;  %v318_v46 = vld [vmem:[%s1078_s4 + $0x50] sm:$0xff]  ;;  %v319_v48 = vld [vmem:[%s1078_s4 + $0x58] sm:$0xff] }
  0x1b   :  { %v600_v47 = vld [vmem:[%s1077_s3 + $0xf0] sm:$0xff]  ;;  %v601_v49 = vld [vmem:[%s1077_s3 + $0xf8] sm:$0xff]  ;;  %v320_v50 = vld [vmem:[%s1078_s4 + $0x60] sm:$0xff] }
  0x1c   :  { %252 = vxpose.xlu1.b32.cont [6/16] (narrow) %v591_v19, 32  ;;  %v602_v51 = vld [vmem:[%s1078_s4 + $0x80] sm:$0xff]  ;;  %v321_v52 = vld [vmem:[%s1078_s4 + $0x68] sm:$0xff]  ;;  %v322_v54 = vld [vmem:[%s1078_s4 + $0x70] sm:$0xff] }
  0x1d   :  { %v603_v53 = vld [vmem:[%s1078_s4 + $0x88] sm:$0xff]  ;;  %v604_v55 = vld [vmem:[%s1078_s4 + $0x90] sm:$0xff]  ;;  %v323_v56 = vld [vmem:[%s1078_s4 + $0x78] sm:$0xff] }
  0x1e   :  { %172 = vxpose.xlu0.b32.cont [8/16] (narrow) %v156_v18, 32  ;;  %v605_v57 = vld [vmem:[%s1078_s4 + $0x98] sm:$0xff]  ;;  %v606_v58 = vld [vmem:[%s1078_s4 + $0xa0] sm:$0xff]  ;;  %v607_v59 = vld [vmem:[%s1078_s4 + $0xa8] sm:$0xff] }
  0x1f   :  { %v608_v60 = vld [vmem:[%s1078_s4 + $0xb0] sm:$0xff]  ;;  %v609_v61 = vld [vmem:[%s1078_s4 + $0xb8] sm:$0xff]  ;;  %v610_v62 = vld [vmem:[%s1078_s4 + $0xc0] sm:$0xff] }
  0x20   :  { %253 = vxpose.xlu1.b32.cont [7/16] (narrow) %v592_v21, 32  ;;  %v611_v63 = vld [vmem:[%s1078_s4 + $0xc8] sm:$0xff]  ;;  %v612_v0 = vld [vmem:[%s1078_s4 + $0xd0] sm:$0xff]  ;;  %v613_v1 = vld [vmem:[%s1078_s4 + $0xd8] sm:$0xff] }
  0x21   :  { %v614_v2 = vld [vmem:[%s1078_s4 + $0xe0] sm:$0xff]  ;;  %v615_v3 = vld [vmem:[%s1078_s4 + $0xe8] sm:$0xff]  ;;  %v616_v4 = vld [vmem:[%s1078_s4 + $0xf0] sm:$0xff] }
  0x22   :  { %173 = vxpose.xlu0.b32.cont [9/16] (narrow) %v157_v20, 32  ;;  %v617_v5 = vld [vmem:[%s1078_s4 + $0xf8] sm:$0xff] }
  0x24   :  { %254 = vxpose.xlu1.b32.cont [8/16] (narrow) %v593_v23, 32  ;;  %v432_v23 = vld [vmem:[%s1079_s5 + $0x8] sm:$0xff] }
  0x26   :  { %174 = vxpose.xlu0.b32.cont [10/16] (narrow) %v158_v22, 32  ;;  %v431_v22 = vld [vmem:[%s1079_s5] sm:$0xff] }
  0x28   :  { %255 = vxpose.xlu1.b32.cont [9/16] (narrow) %v594_v36, 32  ;;  %v440_v36 = vld [vmem:[%s1079_s5 + $0x48] sm:$0xff] }
  0x2a   :  { %175 = vxpose.xlu0.b32.cont [11/16] (narrow) %v159_v24, 32  ;;  %v433_v24 = vld [vmem:[%s1079_s5 + $0x10] sm:$0xff] }
  0x2c   :  { %256 = vxpose.xlu1.b32.cont [10/16] (narrow) %v595_v37, 32  ;;  %v623_v37 = vld [vmem:[%s1079_s5 + $0xa8] sm:$0xff] }
  0x2e   :  { %176 = vxpose.xlu0.b32.cont [12/16] (narrow) %v160_v25, 32  ;;  %v434_v25 = vld [vmem:[%s1079_s5 + $0x18] sm:$0xff] }
  0x30   :  { %257 = vxpose.xlu1.b32.cont [11/16] (narrow) %v596_v39, 32  ;;  %v624_v39 = vld [vmem:[%s1079_s5 + $0xb0] sm:$0xff] }
  0x32   :  { %177 = vxpose.xlu0.b32.cont [13/16] (narrow) %v161_v26, 32  ;;  %v435_v26 = vld [vmem:[%s1079_s5 + $0x20] sm:$0xff] }
  0x34   :  { %258 = vxpose.xlu1.b32.cont [12/16] (narrow) %v597_v41, 32  ;;  %v625_v41 = vld [vmem:[%s1079_s5 + $0xb8] sm:$0xff] }
  0x36   :  { %178 = vxpose.xlu0.b32.cont [14/16] (narrow) %v162_v27, 32  ;;  %v618_v27 = vld [vmem:[%s1079_s5 + $0x80] sm:$0xff] }
  0x38   :  { %259 = vxpose.xlu1.b32.cont [13/16] (narrow) %v598_v43, 32  ;;  %v626_v43 = vld [vmem:[%s1079_s5 + $0xc0] sm:$0xff] }
  0x3a   :  { %179 = vxpose.xlu0.b32.cont [15/16] (narrow) %v163_v28, 32  ;;  %v436_v28 = vld [vmem:[%s1079_s5 + $0x28] sm:$0xff] }
  0x3c   :  { %260 = vxpose.xlu1.b32.cont [14/16] (narrow) %v599_v45, 32  ;;  %v627_v45 = vld [vmem:[%s1079_s5 + $0xc8] sm:$0xff] }
  0x3e   :  { %180 = vxpose.xlu0.b32.end [16/16] (narrow) %v164_v29, 32  ;;  %v619_v29 = vld [vmem:[%s1079_s5 + $0x88] sm:$0xff] }
  0x40   :  { %261 = vxpose.xlu1.b32.cont [15/16] (narrow) %v600_v47, 32  ;;  %v628_v47 = vld [vmem:[%s1079_s5 + $0xd0] sm:$0xff] }
  0x42   :  { %324 = vxpose.xlu0.b32.start [1/16] (narrow) %v308_v30, 32  ;;  %v437_v30 = vld [vmem:[%s1079_s5 + $0x30] sm:$0xff] }
  0x44   :  { %262 = vxpose.xlu1.b32.end [16/16] (narrow) %v601_v49, 32  ;;  %v446_v49 = vld [vmem:[%s1079_s5 + $0x78] sm:$0xff] }
  0x46   :  { %325 = vxpose.xlu0.b32.cont [2/16] (narrow) %v309_v31, 32  ;;  %v620_v31 = vld [vmem:[%s1079_s5 + $0x90] sm:$0xff] }
  0x48   :  { %386 = vxpose.xlu1.b32.start [1/16] (narrow) %v602_v51, 32 }
  0x4a   :  { %326 = vxpose.xlu0.b32.cont [3/16] (narrow) %v310_v32, 32  ;;  %v438_v32 = vld [vmem:[%s1079_s5 + $0x38] sm:$0xff] }
  0x4c   :  { %387 = vxpose.xlu1.b32.cont [2/16] (narrow) %v603_v53, 32  ;;  %v631_v53 = vld [vmem:[%s1079_s5 + $0xe8] sm:$0xff] }
  0x4e   :  { %327 = vxpose.xlu0.b32.cont [4/16] (narrow) %v311_v33, 32  ;;  %v621_v33 = vld [vmem:[%s1079_s5 + $0x98] sm:$0xff] }
  0x50   :  { %388 = vxpose.xlu1.b32.cont [3/16] (narrow) %v604_v55, 32  ;;  %v632_v55 = vld [vmem:[%s1079_s5 + $0xf0] sm:$0xff] }
  0x52   :  { %328 = vxpose.xlu0.b32.cont [5/16] (narrow) %v312_v34, 32  ;;  %v439_v34 = vld [vmem:[%s1079_s5 + $0x40] sm:$0xff] }
  0x54   :  { %389 = vxpose.xlu1.b32.cont [4/16] (narrow) %v605_v57, 32  ;;  %v633_v57 = vld [vmem:[%s1079_s5 + $0xf8] sm:$0xff] }
  0x56   :  { %329 = vxpose.xlu0.b32.cont [6/16] (narrow) %v313_v35, 32  ;;  %v622_v35 = vld [vmem:[%s1079_s5 + $0xa0] sm:$0xff] }
  0x58   :  { %390 = vxpose.xlu1.b32.cont [5/16] (narrow) %v606_v58, 32 }
  0x5a   :  { %330 = vxpose.xlu0.b32.cont [7/16] (narrow) %v314_v38, 32  ;;  %v441_v38 = vld [vmem:[%s1079_s5 + $0x50] sm:$0xff] }
  0x5c   :  { %391 = vxpose.xlu1.b32.cont [6/16] (narrow) %v607_v59, 32 }
  0x5e   :  { %331 = vxpose.xlu0.b32.cont [8/16] (narrow) %v315_v40, 32  ;;  %v442_v40 = vld [vmem:[%s1079_s5 + $0x58] sm:$0xff] }
  0x60   :  { %392 = vxpose.xlu1.b32.cont [7/16] (narrow) %v608_v60, 32 }
  0x62   :  { %332 = vxpose.xlu0.b32.cont [9/16] (narrow) %v316_v42, 32  ;;  %v443_v42 = vld [vmem:[%s1079_s5 + $0x60] sm:$0xff] }
  0x64   :  { %393 = vxpose.xlu1.b32.cont [8/16] (narrow) %v609_v61, 32 }
  0x66   :  { %333 = vxpose.xlu0.b32.cont [10/16] (narrow) %v317_v44, 32  ;;  %v444_v44 = vld [vmem:[%s1079_s5 + $0x68] sm:$0xff] }
  0x68   :  { %394 = vxpose.xlu1.b32.cont [9/16] (narrow) %v610_v62, 32 }
  0x6a   :  { %334 = vxpose.xlu0.b32.cont [11/16] (narrow) %v318_v46, 32  ;;  %v445_v46 = vld [vmem:[%s1079_s5 + $0x70] sm:$0xff] }
  0x6c   :  { %395 = vxpose.xlu1.b32.cont [10/16] (narrow) %v611_v63, 32 }
  0x6e   :  { %335 = vxpose.xlu0.b32.cont [12/16] (narrow) %v319_v48, 32 }
  0x70   :  { %396 = vxpose.xlu1.b32.cont [11/16] (narrow) %v612_v0, 32 }
  0x72   :  { %336 = vxpose.xlu0.b32.cont [13/16] (narrow) %v320_v50, 32  ;;  %v629_v50 = vld [vmem:[%s1079_s5 + $0xd8] sm:$0xff] }
  0x74   :  { %397 = vxpose.xlu1.b32.cont [12/16] (narrow) %v613_v1, 32 }
  0x76   :  { %337 = vxpose.xlu0.b32.cont [14/16] (narrow) %v321_v52, 32  ;;  %v630_v52 = vld [vmem:[%s1079_s5 + $0xe0] sm:$0xff] }
  0x78   :  { %398 = vxpose.xlu1.b32.cont [13/16] (narrow) %v614_v2, 32 }
  0x7a   :  { %338 = vxpose.xlu0.b32.cont [15/16] (narrow) %v322_v54, 32 }
  0x7c   :  { %399 = vxpose.xlu1.b32.cont [14/16] (narrow) %v615_v3, 32 }
  0x7e   :  { %339 = vxpose.xlu0.b32.end [16/16] (narrow) %v323_v56, 32  ;;  %v933_v10 = vpop.trf.xlu0 }
  0x80   :  { %400 = vxpose.xlu1.b32.cont [15/16] (narrow) %v616_v4, 32 }
  0x82   :  { %v935_v11 = vpop.trf.xlu0 }
  0x84   :  { %401 = vxpose.xlu1.b32.end [16/16] (narrow) %v617_v5, 32  ;;  %v263_v48 = vpop.trf.xlu1 }
  0x86   :  { %v937_v12 = vpop.trf.xlu0 }
  0x88   :  { %v264_v51 = vpop.trf.xlu1 }
  0x8a   :  { %v939_v13 = vpop.trf.xlu0 }
  0x8c   :  { %v265_v54 = vpop.trf.xlu1 }
  0x90   :  { %v266_v56 = vpop.trf.xlu1 }
  0xa2   :  { %655 = vset.pattern.permute.xlu1 %v683_v6 }
  0xbe   :  { %v941_v14 = vpop.trf.xlu0 }
  0xc2   :  { %v943_v15 = vpop.trf.xlu0 }
  0xc4   :  { %v402_v58 = vpop.trf.xlu1 }
  0xc6   :  { %v945_v16 = vpop.trf.xlu0 }
  0xc8   :  { %v403_v59 = vpop.trf.xlu1 }
  0xca   :  { %v947_v17 = vpop.trf.xlu0 }
  0xcc   :  { %v404_v60 = vpop.trf.xlu1 }
  0xd0   :  { %v405_v61 = vpop.trf.xlu1 }
  0xd1   :  { %v112_v7 = vpop.f32.mrf.mxu0 }
  0xd2   :  { %116 = vxpose.xlu0.b32.start.end [1/1] (short) (narrow) %v112_v7, 32 }
  0xd3   :  { %v649_v8 = vpop.f32.mrf.mxu0 }
  0xfb   :  { %656 = vset.pattern.permute.xlu0 %v684_v9 }
 0x14e   :  { %v132_v18 = vpop.trf.xlu0 }
 0x14f   :  { %280 = vperm.xlu0 %656, %v132_v18   ;;  %199 = vperm.xlu1 %655, %v132_v18  }
 0x152   :  { %v133_v19 = vpop.trf.xlu0 }
 0x153   :  { %204 = vperm.xlu1 %655, %v133_v19  }
 0x156   :  { %v134_v20 = vpop.trf.xlu0 }
 0x157   :  { %657 = vset.pattern.permute.xlu1 %v684_v9  ;;  %288 = vperm.xlu0 %656, %v134_v20  }
 0x158   :  { %284 = vperm.xlu1 %657, %v133_v19  }
 0x15a   :  { %v135_v21 = vpop.trf.xlu0 }
 0x15b   :  { %292 = vperm.xlu0 %656, %v135_v21  }
 0x15c   :  { %658 = vset.pattern.permute.xlu1 %v683_v6 }
 0x15d   :  { %209 = vperm.xlu1 %658, %v134_v20  }
 0x161   :  { %214 = vperm.xlu1 %658, %v135_v21  }
 0x179   :  { %447 = vxpose.xlu0.b32.start [1/16] (narrow) %v431_v22, 32 }
 0x17d   :  { %448 = vxpose.xlu0.b32.cont [2/16] (narrow) %v432_v23, 32 }
 0x181   :  { %449 = vxpose.xlu0.b32.cont [3/16] (narrow) %v433_v24, 32 }
 0x185   :  { %450 = vxpose.xlu0.b32.cont [4/16] (narrow) %v434_v25, 32 }
 0x189   :  { %451 = vxpose.xlu0.b32.cont [5/16] (narrow) %v435_v26, 32 }
 0x18a   :  { %509 = vxpose.xlu1.b32.start [1/16] (narrow) %v618_v27, 32 }
 0x18d   :  { %452 = vxpose.xlu0.b32.cont [6/16] (narrow) %v436_v28, 32 }
 0x18e   :  { %510 = vxpose.xlu1.b32.cont [2/16] (narrow) %v619_v29, 32 }
 0x191   :  { %453 = vxpose.xlu0.b32.cont [7/16] (narrow) %v437_v30, 32 }
 0x192   :  { %511 = vxpose.xlu1.b32.cont [3/16] (narrow) %v620_v31, 32 }
 0x195   :  { %454 = vxpose.xlu0.b32.cont [8/16] (narrow) %v438_v32, 32 }
 0x196   :  { %512 = vxpose.xlu1.b32.cont [4/16] (narrow) %v621_v33, 32 }
 0x199   :  { %455 = vxpose.xlu0.b32.cont [9/16] (narrow) %v439_v34, 32 }
 0x19a   :  { %513 = vxpose.xlu1.b32.cont [5/16] (narrow) %v622_v35, 32 }
 0x19d   :  { %456 = vxpose.xlu0.b32.cont [10/16] (narrow) %v440_v36, 32 }
 0x19e   :  { %514 = vxpose.xlu1.b32.cont [6/16] (narrow) %v623_v37, 32 }
 0x1a1   :  { %457 = vxpose.xlu0.b32.cont [11/16] (narrow) %v441_v38, 32 }
 0x1a2   :  { %515 = vxpose.xlu1.b32.cont [7/16] (narrow) %v624_v39, 32 }
 0x1a5   :  { %458 = vxpose.xlu0.b32.cont [12/16] (narrow) %v442_v40, 32 }
 0x1a6   :  { %516 = vxpose.xlu1.b32.cont [8/16] (narrow) %v625_v41, 32 }
 0x1a9   :  { %459 = vxpose.xlu0.b32.cont [13/16] (narrow) %v443_v42, 32 }
 0x1aa   :  { %517 = vxpose.xlu1.b32.cont [9/16] (narrow) %v626_v43, 32 }
 0x1ad   :  { %460 = vxpose.xlu0.b32.cont [14/16] (narrow) %v444_v44, 32 }
 0x1ae   :  { %518 = vxpose.xlu1.b32.cont [10/16] (narrow) %v627_v45, 32 }
 0x1b1   :  { %461 = vxpose.xlu0.b32.cont [15/16] (narrow) %v445_v46, 32 }
 0x1b2   :  { %519 = vxpose.xlu1.b32.cont [11/16] (narrow) %v628_v47, 32 }
 0x1b5   :  { %462 = vxpose.xlu0.b32.end [16/16] (narrow) %v446_v49, 32 }
 0x1b6   :  { %520 = vxpose.xlu1.b32.cont [12/16] (narrow) %v629_v50, 32 }
 0x1ba   :  { %521 = vxpose.xlu1.b32.cont [13/16] (narrow) %v630_v52, 32 }
 0x1be   :  { %522 = vxpose.xlu1.b32.cont [14/16] (narrow) %v631_v53, 32 }
 0x1c2   :  { %523 = vxpose.xlu1.b32.cont [15/16] (narrow) %v632_v55, 32 }
 0x1c6   :  { %524 = vxpose.xlu1.b32.end [16/16] (narrow) %v633_v57, 32 }
 0x1ca   :  { %v200_v62 = vpop.permute.xlu1 %199  ;;  %v1045_v0 = vpop.permute.xlu0 %280 }
 0x1cb   :  { %v295_v7 = vmul.f32 %v1045_v0, %v263_v48  ;;  %v217_v18 = vmul.f32 %v200_v62, %v933_v10  ;;  %v356_v27 = vmul.f32 %v941_v14, %v200_v62 }
 0x1ce   :  { %v205_v63 = vpop.permute.xlu1 %204 }
 0x1cf   :  { %v218_v8 = vmul.f32 %v205_v63, %v935_v11  ;;  %v357_v23 = vmul.f32 %v943_v15, %v205_v63  ;;  %v418_v11 = vmul.f32 %v402_v58, %v1045_v0 }
 0x1d1   :  { %v221_v24 = vadd.f32 %v218_v8, %v217_v18  ;;  %v360_v32 = vadd.f32 %v357_v23, %v356_v27 }
 0x1d2   :  { %v1047_v1 = vpop.permute.xlu0 %288 }
 0x1d3   :  { %v285_v2 = vpop.permute.xlu1 %284  ;;  %v297_v20 = vmul.f32 %v1047_v1, %v265_v54  ;;  %v420_v34 = vmul.f32 %v404_v60, %v1047_v1 }
 0x1d4   :  { %v296_v5 = vmul.f32 %v285_v2, %v264_v51  ;;  %v419_v25 = vmul.f32 %v403_v59, %v285_v2 }
 0x1d6   :  { %v1049_v3 = vpop.permute.xlu0 %292  ;;  %v299_v19 = vadd.f32 %v296_v5, %v295_v7  ;;  %v422_v15 = vadd.f32 %v419_v25, %v418_v11 }
 0x1d7   :  { %v298_v10 = vmul.f32 %v1049_v3, %v266_v56  ;;  %v421_v42 = vmul.f32 %v405_v61, %v1049_v3 }
 0x1d8   :  { %v210_v4 = vpop.permute.xlu1 %209  ;;  %v300_v29 = vadd.f32 %v299_v19, %v297_v20  ;;  %v423_v41 = vadd.f32 %v422_v15, %v420_v34 }
 0x1d9   :  { %v219_v21 = vmul.f32 %v210_v4, %v937_v12  ;;  %v358_v28 = vmul.f32 %v945_v16, %v210_v4 }
 0x1da   :  { %v301_v37 = vadd.f32 %v300_v29, %v298_v10  ;;  %v424_v48 = vadd.f32 %v423_v41, %v421_v42 }
 0x1db   :  { %v222_v30 = vadd.f32 %v221_v24, %v219_v21 }
 0x1dc   :  { %v215_v9 = vpop.permute.xlu1 %214  ;;  %v302_v45 = vrot.slane %v301_v37, 4  ;;  %v425_v54 = vrot.slane %v424_v48, 4 }
 0x1dd   :  { %v220_v26 = vmul.f32 %v215_v9, %v939_v13  ;;  %v359_v12 = vmul.f32 %v947_v17, %v215_v9  ;;  %v361_v13 = vadd.f32 %v360_v32, %v358_v28 }
 0x1de   :  { %v303_v50 = vadd.f32 %v302_v45, %v301_v37  ;;  %v426_v61 = vadd.f32 %v425_v54, %v424_v48 }
 0x1df   :  { %v223_v35 = vadd.f32 %v222_v30, %v220_v26  ;;  %v362_v38 = vadd.f32 %v361_v13, %v359_v12 }
 0x1e0   :  { %v304_v56 = vrot.slane %v303_v50, 2  ;;  %v427_v18 = vrot.slane %v426_v61, 2 }
 0x1e1   :  { %v224_v43 = vrot.slane %v223_v35, 4  ;;  %v363_v17 = vrot.slane %v362_v38, 4 }
 0x1e2   :  { %v305_v5 = vadd.f32 %v304_v56, %v303_v50  ;;  %v428_v25 = vadd.f32 %v427_v18, %v426_v61 }
 0x1e3   :  { %v225_v49 = vadd.f32 %v224_v43, %v223_v35  ;;  %v364_v51 = vadd.f32 %v363_v17, %v362_v38  ;;  %v564_v35 = vstv %s1074_s0 }
 0x1e4   :  { %v429_v29 = vrot.slane %v428_v25, 1 }
 0x1e5   :  { %v226_v55 = vrot.slane %v225_v49, 2  ;;  %v365_v58 = vrot.slane %v364_v51, 2 }
 0x1e7   :  { %v366_v7 = vadd.f32 %v365_v58, %v364_v51 }
 0x1e9   :  { %v367_v23 = vrot.slane %v366_v7, 1 }
 0x1eb   :  { %v368_v28 = vadd.f32 %v367_v23, %v366_v7 }
 0x1f5   :  { %v463_v6 = vpop.trf.xlu0 }
 0x1f6   :  { %v479_v36 = vmul.f32 %v463_v6, %v200_v62  ;;  %v227_v62 = vadd.f32 %v226_v55, %v225_v49 }
 0x1f8   :  { %v228_v19 = vrot.slane %v227_v62, 1 }
 0x1f9   :  { %v464_v22 = vpop.trf.xlu0 }
 0x1fa   :  { %v480_v33 = vmul.f32 %v464_v22, %v205_v63  ;;  %v229_v26 = vadd.f32 %v228_v19, %v227_v62 }
 0x1fc   :  { %v483_v39 = vadd.f32 %v480_v33, %v479_v36 }
 0x1fd   :  { %v465_v31 = vpop.trf.xlu0 }
 0x1fe   :  { %v481_v14 = vmul.f32 %v465_v31, %v210_v4 }
 0x200   :  { %v484_v44 = vadd.f32 %v483_v39, %v481_v14 }
 0x201   :  { %v466_v16 = vpop.trf.xlu0 }
 0x202   :  { %v482_v40 = vmul.f32 %v466_v16, %v215_v9 }
 0x204   :  { %v485_v46 = vadd.f32 %v484_v44, %v482_v40 }
 0x206   :  { %v525_v47 = vpop.trf.xlu1  ;;  %v486_v52 = vrot.slane %v485_v46, 4 }
 0x207   :  { %v541_v63 = vmul.f32 %v525_v47, %v1045_v0 }
 0x208   :  { %v487_v59 = vadd.f32 %v486_v52, %v485_v46 }
 0x20a   :  { %v526_v53 = vpop.trf.xlu1  ;;  %v488_v8 = vrot.slane %v487_v59, 2 }
 0x20b   :  { %v542_v57 = vmul.f32 %v526_v53, %v285_v2  ;;  %v306_v2 = vrot.slane %v305_v5, 1 }
 0x20c   :  { %v489_v24 = vadd.f32 %v488_v8, %v487_v59 }
 0x20d   :  { %v545_v6 = vadd.f32 %v542_v57, %v541_v63  ;;  %v307_v0 = vadd.f32 %v306_v2, %v305_v5 }
 0x20e   :  { %v527_v60 = vpop.trf.xlu1  ;;  %v490_v11 = vrot.slane %v489_v24, 1 }
 0x20f   :  { %v543_v4 = vmul.f32 %v527_v60, %v1047_v1  ;;  %v555_v30 = vsel %vm554_vm2, %v229_v26, %v307_v0 }
 0x210   :  { %v491_v32 = vadd.f32 %v490_v11, %v489_v24  ;;  %v557_v12 = vsel %vm556_vm3, %v555_v30, %v368_v28 }
 0x211   :  { %v546_v20 = vadd.f32 %v545_v6, %v543_v4 }
 0x212   :  { %v528_v9 = vpop.trf.xlu1 }
 0x213   :  { %v544_v21 = vmul.f32 %v528_v9, %v1049_v3  ;;  %v430_v3 = vadd.f32 %v429_v29, %v428_v25 }
 0x215   :  { %v547_v22 = vadd.f32 %v546_v20, %v544_v21  ;;  %v559_v34 = vsel %vm558_vm4, %v557_v12, %v430_v3 }
 0x216   :  { %v561_v13 = vsel %vm560_vm5, %v559_v34, %v491_v32 }
 0x217   :  { %v548_v27 = vrot.slane %v547_v22, 4 }
 0x219   :  { %v549_v1 = vadd.f32 %v548_v27, %v547_v22 }
 0x21b   :  { %v550_v10 = vrot.slane %v549_v1, 2 }
 0x21d   :  { %v551_v31 = vadd.f32 %v550_v10, %v549_v1 }
 0x21f   :  { %v552_v33 = vrot.slane %v551_v31, 1 }
 0x221   :  { %v553_v15 = vadd.f32 %v552_v33, %v551_v31 }
 0x223   :  { %v563_v36 = vsel %vm562_vm6, %v561_v13, %v553_v15 }
 0x224   :  { %v565_v14 = vadd.f32 %v564_v35, %v563_v36 }
 0x226   :  { %566 = vst [vmem:[#allocation3] sm:$0x3f] %v565_v14 }
 0x227   :  { %670 = shalt.err (!%p667_p4)
}
 0x228   :  { %576 = dma.vmem_to_hbm [thread:$0]  %s574_s12, 128, %s1080_s6, [#allocation4]  }
 0x229   :  { %679 = dma.done.wait [#allocation4], 128  }
 0x22a   :  { %680 = vsyncadd [#allocation4], 4294967168 }
 0x22b   :  { %580 = vsyncpa [#allocation4], 1 }

</bundles_post_ra>
